<compile_context>
chip_gen: v7x
topology: tpu7x:2x2x1
jax: 0.10.0
libtpu: 0.0.40
codegen_flags: <defaults>
</compile_context>

<pallas_src>
import functools

import jax
import jax.numpy as jnp
from jax.experimental import pallas as pl
from jax.experimental.pallas import tpu as pltpu

_LANE = 128
_SUBLANE = 8
# Safe on every generation: v5e/v6e have 128 MiB physical VMEM (16/32 MiB default
# scoped), v7x has 64 MiB physical (32 MiB default scoped).
_VMEM_LIMIT_BYTES = 48 * 1024 * 1024


# ---------------------------------------------------------------------------
# One-time pltpu.roll probe: establishes availability + direction convention.
# If anything is unexpected we fall back to the (previously validated)
# concatenate-based shifts, so correctness never depends on the probe result.
# ---------------------------------------------------------------------------
_ROLL_MODE_CACHE = []


def _probe_roll_mode():
    """Returns 'np' (roll(x,s)[i]==x[(i-s)%n]), 'flip' (x[(i+s)%n]) or None."""
    if _ROLL_MODE_CACHE:
        return _ROLL_MODE_CACHE[0]

    mode = None
    try:
        def probe(x_ref, a_ref, b_ref, c_ref, d_ref):
            x = x_ref[...]
            a_ref[...] = pltpu.roll(x, 1, axis=2)    # lane roll, small amount
            b_ref[...] = pltpu.roll(x, 1, axis=1)    # sublane roll, small amount
            c_ref[...] = pltpu.roll(x, 15, axis=2)   # lane roll by (W-1)
            d_ref[...] = pltpu.roll(x, 7, axis=1)    # sublane roll by (TH-1)

        w = 16
        col = jnp.arange(w, dtype=jnp.float32)
        row = jnp.arange(8, dtype=jnp.float32) * 100.0
        x = jnp.broadcast_to(row[None, :, None] + col[None, None, :], (2, 8, w))
        sds = jax.ShapeDtypeStruct((2, 8, w), jnp.float32)
        a, b, c, d = pl.pallas_call(probe, out_shape=(sds, sds, sds, sds))(x)
        a5 = float(a[0, 0, 5])   # np: x[0,0,4]=4   flip: x[0,0,6]=6
        b30 = float(b[0, 3, 0])  # np: x[0,2,0]=200 flip: x[0,4,0]=400
        c5 = float(c[0, 0, 5])   # np: x[0,0,6]=6   flip: x[0,0,4]=4
        d30 = float(d[0, 3, 0])  # np: x[0,4,0]=400 flip: x[0,2,0]=200
        if (a5, b30, c5, d30) == (4.0, 200.0, 6.0, 400.0):
            mode = "np"
        elif (a5, b30, c5, d30) == (6.0, 400.0, 4.0, 200.0):
            mode = "flip"
    except Exception:
        mode = None
    _ROLL_MODE_CACHE.append(mode)
    return mode


# ---------------------------------------------------------------------------
# Kernel
# ---------------------------------------------------------------------------
def _edge_loss_kernel(*refs, row_tile, n_row_tiles, valid_last, has_mask,
                      roll_mode):
    # refs (has_mask=True):  p, t, p_halo, t_halo, m, out
    # refs (has_mask=False): p, t, p_halo, t_halo, out
    #   p / t        : (NB, TH, W)      pred / target tile (input dtype, upcast here)
    #   p_halo/t_halo: (NB, 1, 2, W)    [...,0,:] = image row just above the tile,
    #                                   [...,1,:] = row just below (zeros at the
    #                                   image border -> conv2d padding=1 semantics)
    #   m            : (NB, TH, W)      optional mask (any float dtype)
    #   out          : (1, 1, 8, 128)   [0,0,0,0]=sum(|pg-tg|*m), [0,0,0,1]=sum(m)
    if has_mask:
        p_ref, t_ref, ph_ref, th_ref, m_ref, out_ref = refs
    else:
        p_ref, t_ref, ph_ref, th_ref, out_ref = refs
        m_ref = None

    TH = row_tile
    NB, _, W = p_ref.shape
    ragged = valid_last != TH  # last row tile extends past the real image height

    # ---- hoisted index masks (built once per grid step, reused) -------------
    lane = jax.lax.broadcasted_iota(jnp.int32, (1, 1, W), 2)
    keep_r = lane < (W - 1)   # column j+1 exists
    keep_l = lane >= 1        # column j-1 exists
    rows = jax.lax.broadcasted_iota(jnp.int32, (1, TH, 1), 1)
    is_last_row = rows == (TH - 1)
    is_first_row = rows == 0
    row_ok = None
    if ragged:
        vrows = jnp.where(pl.program_id(1) == n_row_tiles - 1, valid_last, TH)
        row_ok = rows < vrows

    def shift_cols(v, delta):
        """y[..., j] = v[..., j + delta], zero outside the image."""
        if roll_mode is None:  # concatenate fallback (known-good path)
            zero_col = jnp.zeros_like(v[..., :1])
            if delta == 1:
                return jnp.concatenate([v[..., 1:], zero_col], axis=-1)
            return jnp.concatenate([zero_col, v[..., :-1]], axis=-1)
        amt = (-delta) % W if roll_mode == "np" else delta % W
        r = pltpu.roll(v, amt, axis=2)
        return jnp.where(keep_r if delta == 1 else keep_l, r, 0.0)

    def shift_rows(v, below, above):
        """Returns (v_up, v_dn) with v_up[i]=v[i+1], v_dn[i]=v[i-1]; the rows
        falling off the tile are spliced in from the halo."""
        if TH == 1:
            return below, above
        if roll_mode is None:
            v_up = jnp.concatenate([v[:, 1:, :], below], axis=1)
            v_dn = jnp.concatenate([above, v[:, :TH - 1, :]], axis=1)
            return v_up, v_dn
        amt_up = (TH - 1) if roll_mode == "np" else 1
        amt_dn = 1 if roll_mode == "np" else (TH - 1)
        v_up = jnp.where(is_last_row, below, pltpu.roll(v, amt_up, axis=1))
        v_dn = jnp.where(is_first_row, above, pltpu.roll(v, amt_dn, axis=1))
        return v_up, v_dn

    def grad_mag(x, halo):
        above = halo[:, :, 0, :]   # (NB, 1, W)
        below = halo[:, :, 1, :]   # (NB, 1, W)
        x_up, x_dn = shift_rows(x, below, above)
        # Separable Sobel (cross-correlation, zero padding):
        #   s = x(i-1) + 2 x(i) + x(i+1);  gx = s(j+1) - s(j-1)
        #   d = x(i+1) - x(i-1);           gy = d(j-1) + 2 d(j) + d(j+1)
        s = x_dn + 2.0 * x + x_up
        d = x_up - x_dn
        gx = shift_cols(s, +1) - shift_cols(s, -1)
        gy = shift_cols(d, -1) + 2.0 * d + shift_cols(d, +1)
        return jnp.sqrt(gx * gx + gy * gy + 1e-6)

    p = p_ref[...].astype(jnp.float32)
    t = t_ref[...].astype(jnp.float32)
    if ragged:
        # Zero the rows past the real image bottom so (a) undefined data in the
        # ragged tail never reaches the math and (b) the last real row sees a
        # zero row below it, matching conv2d(padding=1).
        p = jnp.where(row_ok, p, 0.0)
        t = jnp.where(row_ok, t, 0.0)

    pg = grad_mag(p, ph_ref[...].astype(jnp.float32))
    tg = grad_mag(t, th_ref[...].astype(jnp.float32))
    diff = jnp.abs(pg - tg)

    if has_mask:
        m = m_ref[...].astype(jnp.float32)
        if ragged:
            m = jnp.where(row_ok, m, 0.0)
        loss_sum = jnp.sum(diff * m)
        mask_sum = jnp.sum(m)
    else:
        if ragged:
            diff = jnp.where(row_ok, diff, 0.0)
        loss_sum = jnp.sum(diff)
        mask_sum = jnp.float32(0.0)  # wrapper uses the compile-time constant

    sub = jax.lax.broadcasted_iota(jnp.int32, (_SUBLANE, _LANE), 0)
    ln = jax.lax.broadcasted_iota(jnp.int32, (_SUBLANE, _LANE), 1)
    tile = jnp.where((sub == 0) & (ln == 0), loss_sum,
                     jnp.where((sub == 0) & (ln == 1), mask_sum, 0.0))
    out_ref[...] = tile[None, None]


# ---------------------------------------------------------------------------
# Glue
# ---------------------------------------------------------------------------
def _largest_divisor_leq(n, cap):
    cap = int(max(1, min(n, cap)))
    for d in range(cap, 0, -1):
        if n % d == 0:
            return d
    return 1


def _choose_row_tile(h, row_cap):
    if h <= _SUBLANE:
        return h
    if h <= row_cap and h % _SUBLANE == 0:
        return h
    cap8 = max(_SUBLANE, (min(row_cap, h) // _SUBLANE) * _SUBLANE)
    best = 0
    for d in range(_SUBLANE, cap8 + 1, _SUBLANE):
        if h % d == 0:
            best = d
    # No sublane-aligned divisor: use an aligned tile; the ragged last tile is
    # zero-masked in-kernel (no padding copies in HBM).
    return best if best else cap8


def _halo_rows(x, th, n_tiles):
    """(B, H, W) -> (B, n_tiles, 2, W): image row just above / below each row
    tile (zero rows at the image border -> conv2d padding=1 semantics)."""
    b, _, w = x.shape
    zero = jnp.zeros((b, 1, w), x.dtype)
    if n_tiles == 1:
        above = zero
        below = zero
    else:
        above = jnp.concatenate(
            [zero, x[:, th - 1:(n_tiles - 1) * th:th, :]], axis=1)
        below = jnp.concatenate(
            [x[:, th::th, :][:, :n_tiles - 1, :], zero], axis=1)
    return jnp.stack([above, below], axis=2)


def edge_aware_gradient_loss(pred, target, mask=None, *,
                             row_tile=None, batch_tile=None,
                             block_target_bytes=1 << 20,
                             vmem_limit_bytes=_VMEM_LIMIT_BYTES):
    """Pallas TPU implementation of EdgeAwareGradientLoss.forward.

    Args:
      pred:   (B, H, W) predicted depth (f32 / bf16 / f16).
      target: (B, H, W) ground-truth depth.
      mask:   optional (B, H, W) mask of valid pixels (bool or float).
    Returns:
      scalar float32 loss.
    """
    pred = jnp.asarray(pred)
    target = jnp.asarray(target)

    def ingest(x):
        # bf16/f16 stay narrow in HBM; upcast happens in-kernel.
        return x if x.dtype in (jnp.bfloat16, jnp.float16, jnp.float32) \
            else x.astype(jnp.float32)

    pred = ingest(pred)
    target = ingest(target)
    B, H, W = pred.shape

    has_mask = mask is not None
    if has_mask:
        mask = jnp.asarray(mask)
        if mask.dtype == jnp.bool_:
            mask = mask.astype(jnp.bfloat16)     # 0/1 exact, half of f32 bandwidth
        elif not jnp.issubdtype(mask.dtype, jnp.floating):
            mask = mask.astype(jnp.float32)

    # ---- tiling (blocks use the full width W as their last dim; ~1 MiB/block
    # keeps the double-buffered working set small on every generation) --------
    row_cap = max(_SUBLANE, block_target_bytes // max(1, W * 4))
    user_tiled = row_tile is not None
    if user_tiled:
        TH = max(1, min(int(row_tile), H))
        if TH < H and TH % _SUBLANE:
            TH = max(_SUBLANE, (TH // _SUBLANE) * _SUBLANE)
    else:
        TH = _choose_row_tile(H, row_cap)
    nH = -(-H // TH)

    if batch_tile is not None:
        NB = _largest_divisor_leq(B, int(batch_tile))
    else:
        NB = _largest_divisor_leq(
            B, max(1, block_target_bytes // max(1, TH * W * 4)))
    nBG = B // NB

    # v7x shards "parallel" grid axes across its 2 TensorCores: make sure small
    # inputs still produce >= 2 grid steps so the second core is not idle.
    if not user_tiled and batch_tile is None and nBG * nH == 1:
        if B >= 2:
            NB = _largest_divisor_leq(B, B // 2)
            nBG = B // NB
        elif H >= 2 * _SUBLANE:
            TH = _choose_row_tile(
                H, max(_SUBLANE, (H // 2 // _SUBLANE) * _SUBLANE))
            nH = -(-H // TH)

    valid_last = H - (nH - 1) * TH

    pred_halo = _halo_rows(pred, TH, nH)
    target_halo = _halo_rows(target, TH, nH)

    roll_mode = _probe_roll_mode()

    kernel = functools.partial(
        _edge_loss_kernel, row_tile=TH, n_row_tiles=nH, valid_last=valid_last,
        has_mask=has_mask, roll_mode=roll_mode)

    img_spec = pl.BlockSpec((NB, TH, W), lambda bg, j: (bg, j, 0))
    halo_spec = pl.BlockSpec((NB, 1, 2, W), lambda bg, j: (bg, j, 0, 0))
    in_specs = [img_spec, img_spec, halo_spec, halo_spec]
    args = [pred, target, pred_halo, target_halo]
    if has_mask:
        in_specs.append(img_spec)
        args.append(mask)

    partials = pl.pallas_call(
        kernel,
        out_shape=jax.ShapeDtypeStruct((nBG, nH, _SUBLANE, _LANE), jnp.float32),
        grid=(nBG, nH),
        in_specs=in_specs,
        out_specs=pl.BlockSpec((1, 1, _SUBLANE, _LANE),
                               lambda bg, j: (bg, j, 0, 0)),
        compiler_params=pltpu.CompilerParams(
            dimension_semantics=("parallel", "parallel"),
            vmem_limit_bytes=int(vmem_limit_bytes)),
    )(*args)

    loss_sum = jnp.sum(partials[:, :, 0, 0])
    if has_mask:
        mask_sum = jnp.sum(partials[:, :, 0, 1])
        # PyTorch: if valid_mask.sum() == 0 -> return 0.0
        return jnp.where(mask_sum == 0, jnp.float32(0.0),
                         loss_sum / (mask_sum + 1e-6))
    # mask=None: denominator is the compile-time constant B*H*W.
    return loss_sum / (jnp.float32(B * H * W) + 1e-6)


# ---------------------------------------------------------------------------
# Pure-JAX reference (mirrors the PyTorch module) and self-test
# ---------------------------------------------------------------------------
def _reference_loss(pred, target, mask):
    sobel_x = jnp.array([[-1, 0, 1], [-2, 0, 2], [-1, 0, 1]],
                        jnp.float32).reshape(1, 1, 3, 3)
    sobel_y = jnp.array([[-1, -2, -1], [0, 0, 0], [1, 2, 1]],
                        jnp.float32).reshape(1, 1, 3, 3)
    p = pred[:, None].astype(jnp.float32)
    t = target[:, None].astype(jnp.float32)
    m = mask[:, None].astype(jnp.float32)

    def conv(x, w):
        return jax.lax.conv_general_dilated(x, w, (1, 1), ((1, 1), (1, 1)))

    pgx, pgy = conv(p, sobel_x), conv(p, sobel_y)
    tgx, tgy = conv(t, sobel_x), conv(t, sobel_y)
    pg = jnp.sqrt(pgx ** 2 + pgy ** 2 + 1e-6)
    tg = jnp.sqrt(tgx ** 2 + tgy ** 2 + 1e-6)
    loss = jnp.abs(pg - tg) * m
    return loss.sum() / (m.sum() + 1e-6)


if __name__ == "__main__":
    key = jax.random.PRNGKey(0)
    k1, k2, k3, k4, k5, k6, k7 = jax.random.split(key, 7)

    # Case 1: nominal small shape; bool mask streamed as bf16; non-ragged rows;
    # batch split so the parallel grid has 2 steps.
    B, H, W = 2, 16, 16
    pred = jax.random.uniform(k1, (B, H, W), jnp.float32, 0.1, 10.0)
    target = jax.random.uniform(k2, (B, H, W), jnp.float32, 0.1, 10.0)
    mask_bool = jax.random.uniform(k3, (B, H, W)) > 0.2
    out = jax.block_until_ready(edge_aware_gradient_loss(pred, target, mask_bool))
    ref = jax.block_until_ready(
        _reference_loss(pred, target, mask_bool.astype(jnp.float32)))
    assert jnp.allclose(out, ref, rtol=1e-4, atol=1e-5), (out, ref)

    # Case 2: mask=None (no mask stream, constant denominator); forced row tiling
    # with a ragged last tile (H=20, TH=8) -> cross-tile halos + in-kernel tail mask.
    B2, H2, W2 = 2, 20, 16
    pred2 = jax.random.uniform(k4, (B2, H2, W2), jnp.float32, 0.1, 10.0)
    target2 = jax.random.uniform(k5, (B2, H2, W2), jnp.float32, 0.1, 10.0)
    out2 = jax.block_until_ready(
        edge_aware_gradient_loss(pred2, target2, None, row_tile=8))
    ref2 = jax.block_until_ready(
        _reference_loss(pred2, target2, jnp.ones((B2, H2, W2), jnp.float32)))
    assert jnp.allclose(out2, ref2, rtol=1e-4, atol=1e-5), (out2, ref2)

    # Case 3: bf16 inputs stay bf16 in HBM (in-kernel upcast), mask=None,
    # single image auto-split into >= 2 row tiles.
    B3, H3, W3 = 1, 16, 24
    pred3 = jax.random.uniform(k6, (B3, H3, W3), jnp.float32, 0.1, 10.0
                               ).astype(jnp.bfloat16)
    target3 = jax.random.uniform(k7, (B3, H3, W3), jnp.float32, 0.1, 10.0
                                 ).astype(jnp.bfloat16)
    out3 = jax.block_until_ready(edge_aware_gradient_loss(pred3, target3))
    ref3 = jax.block_until_ready(
        _reference_loss(pred3, target3, jnp.ones((B3, H3, W3), jnp.float32)))
    assert jnp.allclose(out3, ref3, rtol=1e-3, atol=1e-4), (out3, ref3)

    print("KERNEL_OK")
</pallas_src>

<mosaic_0001>
module attributes {stable_mosaic.version = 11 : i64} {
  func.func @probe(%arg0: memref<2x8x16xf32, #tpu.memory_space<vmem>>, %arg1: memref<2x8x16xf32, #tpu.memory_space<vmem>>, %arg2: memref<2x8x16xf32, #tpu.memory_space<vmem>>, %arg3: memref<2x8x16xf32, #tpu.memory_space<vmem>>, %arg4: memref<2x8x16xf32, #tpu.memory_space<vmem>>) attributes {dimension_semantics = [], scalar_prefetch = 0 : i64, scratch_operands = 0 : i64, tpu.core_type = #tpu.core_type<tc>} {
    %c0 = arith.constant 0 : index
    %c0_0 = arith.constant 0 : index
    %c0_1 = arith.constant 0 : index
    %0 = vector.load %arg0[%c0, %c0_0, %c0_1] : memref<2x8x16xf32, #tpu.memory_space<vmem>>, vector<2x8x16xf32>
    %c1_i32 = arith.constant 1 : i32
    %1 = tpu.dynamic_rotate %0 by %c1_i32 dim 2 : vector<2x8x16xf32>, i32 -> vector<2x8x16xf32>
    %c0_2 = arith.constant 0 : index
    %c0_3 = arith.constant 0 : index
    %c0_4 = arith.constant 0 : index
    %2 = vector.load %arg1[%c0_2, %c0_3, %c0_4] : memref<2x8x16xf32, #tpu.memory_space<vmem>>, vector<2x8x16xf32>
    tpu.vector_store %arg1[%c0_2, %c0_3, %c0_4], %1 {strides = array<i32>} : memref<2x8x16xf32, #tpu.memory_space<vmem>>, vector<2x8x16xf32>,
    %c1_i32_5 = arith.constant 1 : i32
    %3 = tpu.dynamic_rotate %0 by %c1_i32_5 dim 1 : vector<2x8x16xf32>, i32 -> vector<2x8x16xf32>
    %c0_6 = arith.constant 0 : index
    %c0_7 = arith.constant 0 : index
    %c0_8 = arith.constant 0 : index
    %4 = vector.load %arg2[%c0_6, %c0_7, %c0_8] : memref<2x8x16xf32, #tpu.memory_space<vmem>>, vector<2x8x16xf32>
    tpu.vector_store %arg2[%c0_6, %c0_7, %c0_8], %3 {strides = array<i32>} : memref<2x8x16xf32, #tpu.memory_space<vmem>>, vector<2x8x16xf32>,
    %c15_i32 = arith.constant 15 : i32
    %5 = tpu.dynamic_rotate %0 by %c15_i32 dim 2 : vector<2x8x16xf32>, i32 -> vector<2x8x16xf32>
    %c0_9 = arith.constant 0 : index
    %c0_10 = arith.constant 0 : index
    %c0_11 = arith.constant 0 : index
    %6 = vector.load %arg3[%c0_9, %c0_10, %c0_11] : memref<2x8x16xf32, #tpu.memory_space<vmem>>, vector<2x8x16xf32>
    tpu.vector_store %arg3[%c0_9, %c0_10, %c0_11], %5 {strides = array<i32>} : memref<2x8x16xf32, #tpu.memory_space<vmem>>, vector<2x8x16xf32>,
    %c7_i32 = arith.constant 7 : i32
    %7 = tpu.dynamic_rotate %0 by %c7_i32 dim 1 : vector<2x8x16xf32>, i32 -> vector<2x8x16xf32>
    %c0_12 = arith.constant 0 : index
    %c0_13 = arith.constant 0 : index
    %c0_14 = arith.constant 0 : index
    %8 = vector.load %arg4[%c0_12, %c0_13, %c0_14] : memref<2x8x16xf32, #tpu.memory_space<vmem>>, vector<2x8x16xf32>
    tpu.vector_store %arg4[%c0_12, %c0_13, %c0_14], %7 {strides = array<i32>} : memref<2x8x16xf32, #tpu.memory_space<vmem>>, vector<2x8x16xf32>,
    return
  }
}

module attributes {stable_mosaic.version = 11 : i64} {
  func.func @_edge_loss_kernel(%arg0: i32, %arg1: i32, %arg2: memref<1x16x16xf32, #tpu.memory_space<vmem>>, %arg3: memref<1x16x16xf32, #tpu.memory_space<vmem>>, %arg4: memref<1x1x2x16xf32, #tpu.memory_space<vmem>>, %arg5: memref<1x1x2x16xf32, #tpu.memory_space<vmem>>, %arg6: memref<1x16x16xbf16, #tpu.memory_space<vmem>>, %arg7: memref<1x1x8x128xf32, #tpu.memory_space<vmem>>) attributes {dimension_semantics = [#tpu.dimension_semantics<parallel>, #tpu.dimension_semantics<parallel>], iteration_bounds = array<i64: 2, 1>, scalar_prefetch = 0 : i64, scratch_operands = 0 : i64, tpu.core_type = #tpu.core_type<tc>, window_params = [{transform_indices = @transform_0, window_bounds = array<i64: 1, 16, 16>}, {transform_indices = @transform_1, window_bounds = array<i64: 1, 16, 16>}, {transform_indices = @transform_2, window_bounds = array<i64: 1, 1, 2, 16>}, {transform_indices = @transform_3, window_bounds = array<i64: 1, 1, 2, 16>}, {transform_indices = @transform_4, window_bounds = array<i64: 1, 16, 16>}, {transform_indices = @transform_5, window_bounds = array<i64: 1, 1, 8, 128>}]} {
    %c0 = arith.constant 0 : index
    %c0_0 = arith.constant 0 : index
    %c0_1 = arith.constant 0 : index
    %0 = vector.load %arg2[%c0, %c0_0, %c0_1] : memref<1x16x16xf32, #tpu.memory_space<vmem>>, vector<1x16x16xf32>
    %c0_2 = arith.constant 0 : index
    %c0_3 = arith.constant 0 : index
    %c0_4 = arith.constant 0 : index
    %1 = vector.load %arg3[%c0_2, %c0_3, %c0_4] : memref<1x16x16xf32, #tpu.memory_space<vmem>>, vector<1x16x16xf32>
    %c0_5 = arith.constant 0 : index
    %c0_6 = arith.constant 0 : index
    %c0_7 = arith.constant 0 : index
    %c0_8 = arith.constant 0 : index
    %2 = vector.load %arg4[%c0_5, %c0_6, %c0_7, %c0_8] : memref<1x1x2x16xf32, #tpu.memory_space<vmem>>, vector<1x1x2x16xf32>
    %3 = vector.extract_strided_slice %2 {offsets = [0, 0, 0, 0], sizes = [1, 1, 1, 16], strides = [1, 1, 1, 1]} : vector<1x1x2x16xf32> to vector<1x1x1x16xf32>
    %4 = vector.shape_cast %3 : vector<1x1x1x16xf32> to vector<1x1x16xf32>
    %5 = vector.extract_strided_slice %2 {offsets = [0, 0, 1, 0], sizes = [1, 1, 1, 16], strides = [1, 1, 1, 1]} : vector<1x1x2x16xf32> to vector<1x1x1x16xf32>
    %6 = vector.shape_cast %5 : vector<1x1x1x16xf32> to vector<1x1x16xf32>
    %7 = vector.extract_strided_slice %0 {offsets = [0, 1, 0], sizes = [1, 15, 16], strides = [1, 1, 1]} : vector<1x16x16xf32> to vector<1x15x16xf32>
    %8 = tpu.concatenate %7, %6 in 1 : vector<1x15x16xf32>, vector<1x1x16xf32> -> vector<1x16x16xf32>
    %9 = vector.extract_strided_slice %0 {offsets = [0, 0, 0], sizes = [1, 15, 16], strides = [1, 1, 1]} : vector<1x16x16xf32> to vector<1x15x16xf32>
    %10 = tpu.concatenate %4, %9 in 1 : vector<1x1x16xf32>, vector<1x15x16xf32> -> vector<1x16x16xf32>
    %cst = arith.constant 2.000000e+00 : f32
    %11 = vector.broadcast %cst : f32 to vector<1x16x16xf32>
    %12 = arith.mulf %11, %0 : vector<1x16x16xf32>
    %13 = arith.addf %10, %12 : vector<1x16x16xf32>
    %14 = arith.addf %13, %8 : vector<1x16x16xf32>
    %15 = arith.subf %8, %10 : vector<1x16x16xf32>
    %cst_9 = arith.constant 0.000000e+00 : f32
    %16 = vector.broadcast %cst_9 : f32 to vector<1x16x1xf32>
    %17 = vector.extract_strided_slice %14 {offsets = [0, 0, 1], sizes = [1, 16, 15], strides = [1, 1, 1]} : vector<1x16x16xf32> to vector<1x16x15xf32>
    %18 = tpu.concatenate %17, %16 in 2 : vector<1x16x15xf32>, vector<1x16x1xf32> -> vector<1x16x16xf32>
    %cst_10 = arith.constant 0.000000e+00 : f32
    %19 = vector.broadcast %cst_10 : f32 to vector<1x16x1xf32>
    %20 = vector.extract_strided_slice %14 {offsets = [0, 0, 0], sizes = [1, 16, 15], strides = [1, 1, 1]} : vector<1x16x16xf32> to vector<1x16x15xf32>
    %21 = tpu.concatenate %19, %20 in 2 : vector<1x16x1xf32>, vector<1x16x15xf32> -> vector<1x16x16xf32>
    %22 = arith.subf %18, %21 : vector<1x16x16xf32>
    %cst_11 = arith.constant 0.000000e+00 : f32
    %23 = vector.broadcast %cst_11 : f32 to vector<1x16x1xf32>
    %24 = vector.extract_strided_slice %15 {offsets = [0, 0, 0], sizes = [1, 16, 15], strides = [1, 1, 1]} : vector<1x16x16xf32> to vector<1x16x15xf32>
    %25 = tpu.concatenate %23, %24 in 2 : vector<1x16x1xf32>, vector<1x16x15xf32> -> vector<1x16x16xf32>
    %cst_12 = arith.constant 2.000000e+00 : f32
    %26 = vector.broadcast %cst_12 : f32 to vector<1x16x16xf32>
    %27 = arith.mulf %26, %15 : vector<1x16x16xf32>
    %28 = arith.addf %25, %27 : vector<1x16x16xf32>
    %cst_13 = arith.constant 0.000000e+00 : f32
    %29 = vector.broadcast %cst_13 : f32 to vector<1x16x1xf32>
    %30 = vector.extract_strided_slice %15 {offsets = [0, 0, 1], sizes = [1, 16, 15], strides = [1, 1, 1]} : vector<1x16x16xf32> to vector<1x16x15xf32>
    %31 = tpu.concatenate %30, %29 in 2 : vector<1x16x15xf32>, vector<1x16x1xf32> -> vector<1x16x16xf32>
    %32 = arith.addf %28, %31 : vector<1x16x16xf32>
    %33 = arith.mulf %22, %22 : vector<1x16x16xf32>
    %34 = arith.mulf %32, %32 : vector<1x16x16xf32>
    %35 = arith.addf %33, %34 : vector<1x16x16xf32>
    %cst_14 = arith.constant 9.99999997E-7 : f32
    %36 = vector.broadcast %cst_14 : f32 to vector<1x16x16xf32>
    %37 = arith.addf %35, %36 : vector<1x16x16xf32>
    %38 = math.sqrt %37 : vector<1x16x16xf32>
    %c0_15 = arith.constant 0 : index
    %c0_16 = arith.constant 0 : index
    %c0_17 = arith.constant 0 : index
    %c0_18 = arith.constant 0 : index
    %39 = vector.load %arg5[%c0_15, %c0_16, %c0_17, %c0_18] : memref<1x1x2x16xf32, #tpu.memory_space<vmem>>, vector<1x1x2x16xf32>
    %40 = vector.extract_strided_slice %39 {offsets = [0, 0, 0, 0], sizes = [1, 1, 1, 16], strides = [1, 1, 1, 1]} : vector<1x1x2x16xf32> to vector<1x1x1x16xf32>
    %41 = vector.shape_cast %40 : vector<1x1x1x16xf32> to vector<1x1x16xf32>
    %42 = vector.extract_strided_slice %39 {offsets = [0, 0, 1, 0], sizes = [1, 1, 1, 16], strides = [1, 1, 1, 1]} : vector<1x1x2x16xf32> to vector<1x1x1x16xf32>
    %43 = vector.shape_cast %42 : vector<1x1x1x16xf32> to vector<1x1x16xf32>
    %44 = vector.extract_strided_slice %1 {offsets = [0, 1, 0], sizes = [1, 15, 16], strides = [1, 1, 1]} : vector<1x16x16xf32> to vector<1x15x16xf32>
    %45 = tpu.concatenate %44, %43 in 1 : vector<1x15x16xf32>, vector<1x1x16xf32> -> vector<1x16x16xf32>
    %46 = vector.extract_strided_slice %1 {offsets = [0, 0, 0], sizes = [1, 15, 16], strides = [1, 1, 1]} : vector<1x16x16xf32> to vector<1x15x16xf32>
    %47 = tpu.concatenate %41, %46 in 1 : vector<1x1x16xf32>, vector<1x15x16xf32> -> vector<1x16x16xf32>
    %cst_19 = arith.constant 2.000000e+00 : f32
    %48 = vector.broadcast %cst_19 : f32 to vector<1x16x16xf32>
    %49 = arith.mulf %48, %1 : vector<1x16x16xf32>
    %50 = arith.addf %47, %49 : vector<1x16x16xf32>
    %51 = arith.addf %50, %45 : vector<1x16x16xf32>
    %52 = arith.subf %45, %47 : vector<1x16x16xf32>
    %cst_20 = arith.constant 0.000000e+00 : f32
    %53 = vector.broadcast %cst_20 : f32 to vector<1x16x1xf32>
    %54 = vector.extract_strided_slice %51 {offsets = [0, 0, 1], sizes = [1, 16, 15], strides = [1, 1, 1]} : vector<1x16x16xf32> to vector<1x16x15xf32>
    %55 = tpu.concatenate %54, %53 in 2 : vector<1x16x15xf32>, vector<1x16x1xf32> -> vector<1x16x16xf32>
    %cst_21 = arith.constant 0.000000e+00 : f32
    %56 = vector.broadcast %cst_21 : f32 to vector<1x16x1xf32>
    %57 = vector.extract_strided_slice %51 {offsets = [0, 0, 0], sizes = [1, 16, 15], strides = [1, 1, 1]} : vector<1x16x16xf32> to vector<1x16x15xf32>
    %58 = tpu.concatenate %56, %57 in 2 : vector<1x16x1xf32>, vector<1x16x15xf32> -> vector<1x16x16xf32>
    %59 = arith.subf %55, %58 : vector<1x16x16xf32>
    %cst_22 = arith.constant 0.000000e+00 : f32
    %60 = vector.broadcast %cst_22 : f32 to vector<1x16x1xf32>
    %61 = vector.extract_strided_slice %52 {offsets = [0, 0, 0], sizes = [1, 16, 15], strides = [1, 1, 1]} : vector<1x16x16xf32> to vector<1x16x15xf32>
    %62 = tpu.concatenate %60, %61 in 2 : vector<1x16x1xf32>, vector<1x16x15xf32> -> vector<1x16x16xf32>
    %cst_23 = arith.constant 2.000000e+00 : f32
    %63 = vector.broadcast %cst_23 : f32 to vector<1x16x16xf32>
    %64 = arith.mulf %63, %52 : vector<1x16x16xf32>
    %65 = arith.addf %62, %64 : vector<1x16x16xf32>
    %cst_24 = arith.constant 0.000000e+00 : f32
    %66 = vector.broadcast %cst_24 : f32 to vector<1x16x1xf32>
    %67 = vector.extract_strided_slice %52 {offsets = [0, 0, 1], sizes = [1, 16, 15], strides = [1, 1, 1]} : vector<1x16x16xf32> to vector<1x16x15xf32>
    %68 = tpu.concatenate %67, %66 in 2 : vector<1x16x15xf32>, vector<1x16x1xf32> -> vector<1x16x16xf32>
    %69 = arith.addf %65, %68 : vector<1x16x16xf32>
    %70 = arith.mulf %59, %59 : vector<1x16x16xf32>
    %71 = arith.mulf %69, %69 : vector<1x16x16xf32>
    %72 = arith.addf %70, %71 : vector<1x16x16xf32>
    %cst_25 = arith.constant 9.99999997E-7 : f32
    %73 = vector.broadcast %cst_25 : f32 to vector<1x16x16xf32>
    %74 = arith.addf %72, %73 : vector<1x16x16xf32>
    %75 = math.sqrt %74 : vector<1x16x16xf32>
    %76 = arith.subf %38, %75 : vector<1x16x16xf32>
    %77 = math.absf %76 : vector<1x16x16xf32>
    %c0_26 = arith.constant 0 : index
    %c0_27 = arith.constant 0 : index
    %c0_28 = arith.constant 0 : index
    %78 = vector.load %arg6[%c0_26, %c0_27, %c0_28] : memref<1x16x16xbf16, #tpu.memory_space<vmem>>, vector<1x16x16xbf16>
    %79 = arith.extf %78 : vector<1x16x16xbf16> to vector<1x16x16xf32>
    %80 = arith.mulf %77, %79 : vector<1x16x16xf32>
    %81 = vector.shape_cast %80 : vector<1x16x16xf32> to vector<1x1x16x16xf32>
    %cst_29 = arith.constant dense<0.000000e+00> : vector<1xf32>
    %82 = vector.multi_reduction <add>, %81, %cst_29 [1, 2, 3] : vector<1x1x16x16xf32> to vector<1xf32>
    %83 = vector.shape_cast %82 : vector<1xf32> to vector<1x1x1x1xf32>
    %84 = vector.extract %83[0, 0, 0, 0] : f32 from vector<1x1x1x1xf32>
    %85 = vector.shape_cast %79 : vector<1x16x16xf32> to vector<1x1x16x16xf32>
    %cst_30 = arith.constant dense<0.000000e+00> : vector<1xf32>
    %86 = vector.multi_reduction <add>, %85, %cst_30 [1, 2, 3] : vector<1x1x16x16xf32> to vector<1xf32>
    %87 = vector.shape_cast %86 : vector<1xf32> to vector<1x1x1x1xf32>
    %88 = vector.extract %87[0, 0, 0, 0] : f32 from vector<1x1x1x1xf32>
    %89 = tpu.iota {dimensions = array<i32: 0>} : vector<8x128xi32>
    %90 = tpu.iota {dimensions = array<i32: 1>} : vector<8x128xi32>
    %c0_i32 = arith.constant 0 : i32
    %91 = vector.broadcast %c0_i32 : i32 to vector<8x128xi32>
    %92 = arith.cmpi eq, %89, %91 : vector<8x128xi32>
    %c0_i32_31 = arith.constant 0 : i32
    %93 = vector.broadcast %c0_i32_31 : i32 to vector<8x128xi32>
    %94 = arith.cmpi eq, %90, %93 : vector<8x128xi32>
    %95 = arith.andi %92, %94 : vector<8x128xi1>
    %c0_i32_32 = arith.constant 0 : i32
    %96 = vector.broadcast %c0_i32_32 : i32 to vector<8x128xi32>
    %97 = arith.cmpi eq, %89, %96 : vector<8x128xi32>
    %c1_i32 = arith.constant 1 : i32
    %98 = vector.broadcast %c1_i32 : i32 to vector<8x128xi32>
    %99 = arith.cmpi eq, %90, %98 : vector<8x128xi32>
    %100 = arith.andi %97, %99 : vector<8x128xi1>
    %cst_33 = arith.constant 0.000000e+00 : f32
    %101 = vector.broadcast %88 : f32 to vector<8x128xf32>
    %102 = vector.broadcast %cst_33 : f32 to vector<8x128xf32>
    %103 = arith.select %100, %101, %102 : vector<8x128xi1>, vector<8x128xf32>
    %104 = vector.broadcast %84 : f32 to vector<8x128xf32>
    %105 = arith.select %95, %104, %103 : vector<8x128xi1>, vector<8x128xf32>
    %106 = vector.shape_cast %105 : vector<8x128xf32> to vector<1x1x8x128xf32>
    %c0_34 = arith.constant 0 : index
    %c0_35 = arith.constant 0 : index
    %c0_36 = arith.constant 0 : index
    %c0_37 = arith.constant 0 : index
    %107 = vector.load %arg7[%c0_34, %c0_35, %c0_36, %c0_37] : memref<1x1x8x128xf32, #tpu.memory_space<vmem>>, vector<1x1x8x128xf32>
    tpu.vector_store %arg7[%c0_34, %c0_35, %c0_36, %c0_37], %106 {strides = array<i32>} : memref<1x1x8x128xf32, #tpu.memory_space<vmem>>, vector<1x1x8x128xf32>,
    return
  }
  func.func @transform_0(%arg0: i32, %arg1: i32) -> (i32, i32, i32) {
    %c0_i32 = arith.constant 0 : i32
    %c0_i32_0 = arith.constant 0 : i32
    return %arg0, %arg1, %c0_i32 : i32, i32, i32
  }
  func.func @transform_1(%arg0: i32, %arg1: i32) -> (i32, i32, i32) {
    %c0_i32 = arith.constant 0 : i32
    %c0_i32_0 = arith.constant 0 : i32
    return %arg0, %arg1, %c0_i32 : i32, i32, i32
  }
  func.func @transform_2(%arg0: i32, %arg1: i32) -> (i32, i32, i32, i32) {
    %c0_i32 = arith.constant 0 : i32
    %c0_i32_0 = arith.constant 0 : i32
    %c0_i32_1 = arith.constant 0 : i32
    return %arg0, %arg1, %c0_i32, %c0_i32_0 : i32, i32, i32, i32
  }
  func.func @transform_3(%arg0: i32, %arg1: i32) -> (i32, i32, i32, i32) {
    %c0_i32 = arith.constant 0 : i32
    %c0_i32_0 = arith.constant 0 : i32
    %c0_i32_1 = arith.constant 0 : i32
    return %arg0, %arg1, %c0_i32, %c0_i32_0 : i32, i32, i32, i32
  }
  func.func @transform_4(%arg0: i32, %arg1: i32) -> (i32, i32, i32) {
    %c0_i32 = arith.constant 0 : i32
    %c0_i32_0 = arith.constant 0 : i32
    return %arg0, %arg1, %c0_i32 : i32, i32, i32
  }
  func.func @transform_5(%arg0: i32, %arg1: i32) -> (i32, i32, i32, i32) {
    %c0_i32 = arith.constant 0 : i32
    %c0_i32_0 = arith.constant 0 : i32
    %c0_i32_1 = arith.constant 0 : i32
    return %arg0, %arg1, %c0_i32, %c0_i32_0 : i32, i32, i32, i32
  }
}

</mosaic_0001>

<bundles_post_ra>
// kernel: tpu_custom_call.1
= control target key start
LH: loop header
LB: loop body
LE: loop exit
PB: predicated region body
PF: predicated region fallthrough
CT: control target
= control target key end

     0   :  { %10 = vsyncpa [#allocation3], 0  ;;  %s385_s0 = inlined_call_operand.hbm [shape: f32[2,8,16], index: 0, kind: input, shape index: {}]   ;;  %s386_s1 = inlined_call_operand.hbm [shape: f32[2,8,16], index: 1, kind: output, shape index: {0}]   ;;  %s387_s2 = inlined_call_operand.hbm [shape: f32[2,8,16], index: 2, kind: output, shape index: {1}]   ;;  %s388_s3 = inlined_call_operand.hbm [shape: f32[2,8,16], index: 3, kind: output, shape index: {2}]   ;;  %s389_s4 = inlined_call_operand.hbm [shape: f32[2,8,16], index: 4, kind: output, shape index: {3}]  }
   0x1   :  { %11 = vsyncpa [#allocation4], 0 }
   0x2   :  { %12 = vsyncpa [#allocation7], 0 }
   0x3   :  { %13 = vsyncpa [#allocation10], 0  ;;  %s263_s15 = smov [#allocation2]   ;;  %s145_s19 = scalar_lea.hbm %s385_s0, 256 }
   0x4   :  { %s19_s16 = sshll.u32 %s263_s15, 4  ;;  %p146_p0 = scmp.ne.s32.totalorder %s385_s0, %s145_s19  ;;  %s20_s16 = int_to_ptr.vmem [resolvable:$true] %s19_s16 }
   0x5   :  { %p149_p1 = scmp.lt.u32.totalorder %s145_s19, %s385_s0 }
   0x7   :  { %p151_p2 = pnand %p149_p1, %p146_p0 }
   0x9   :  { %154 = shalt.err (!%p151_p2)
}
   0xa   :  { %s155_s24 = scalar_lea.vmem %s20_s16, 256  ;;  %p160_p4 = scmp.lt.s32.totalorder %s20_s16, %s20_s16 }
   0xb   :  { %p156_p3 = scmp.ne.s32.totalorder %s20_s16, %s155_s24  ;;  %p161_p5 = scmp.lt.s32.totalorder %s155_s24, %s155_s24 }
   0xd   :  { %p162_p6 = por %p161_p5, %p160_p4 }
   0xf   :  { %p163_p7 = pnand %p162_p6, %p156_p3 }
  0x11   :  { %166 = shalt.err (!%p163_p7)
}
  0x12   :  { %s264_s25 = smov 128   ;;  %s265_s26 = smov 8  }
  0x13   :  { %25 = dma.hbm_to_vmem [thread:$0]  %s385_s0, 256, %s20_s16, [#allocation3], %s264_s25, %s264_s25, %s265_s26  }
  0x14   :  { %255 = dma.done.wait [#allocation3], 256  }
  0x15   :  { %256 = vsyncadd [#allocation3], 4294967040  ;;  %v29_v0 = vld [vmem:[#allocation2] sm:$0xff]  ;;  %s266_s29 = smov 16   ;;  %v30_v1 = vld [vmem:[#allocation2 + $0x8] sm:$0xff]  ;;  %vm31_vm0 = vcmask 1047680  }
  0x16   :  { %32 = vrot.lane.b32.xlu0 %v29_v0, %s266_s29  ;;  %v55_v6 = vrot.slane %v29_v0, 7  ;;  %v56_v7 = vrot.slane %v30_v1, 7  ;;  %vm52_vm1 = vcmask 130048   ;;  %s267_s0 = smov [#allocation6]   ;;  %v67_v8 = vrot.slane %v29_v0, 1 }
  0x17   :  { %s88_s30 = sshll.u32 %s267_s0, 4  ;;  %v68_v9 = vrot.slane %v30_v1, 1  ;;  %s89_s30 = int_to_ptr.vmem [resolvable:$true] %s88_s30 }
  0x18   :  { %57 = vst.msk [vmem:[#allocation6] sm:$0xff] %vm52_vm1, %v55_v6  ;;  %58 = vst.msk [vmem:[#allocation6 + $0x8] sm:$0xff] %vm52_vm1, %v56_v7  ;;  %s167_s5 = scalar_lea.vmem %s89_s30, 256  ;;  %p172_p9 = scmp.lt.s32.totalorder %s89_s30, %s89_s30 }
  0x19   :  { %p168_p8 = scmp.ne.s32.totalorder %s89_s30, %s167_s5  ;;  %p173_p10 = scmp.lt.s32.totalorder %s167_s5, %s167_s5 }
  0x1a   :  { %35 = vrot.lane.b32.xlu0 %v30_v1, %s266_s29 }
  0x1b   :  { %p174_p11 = por %p173_p10, %p172_p9 }
  0x1d   :  { %p175_p12 = pnand %p174_p11, %p168_p8 }
  0x88   :  { %v33_v2 = vpop.permute.xlu0 %32 }
  0x89   :  { %v34_v3 = vsel %vm31_vm0, %v33_v2, %v29_v0 }
  0x8a   :  { %38 = vrot.lane.b32.xlu1 %v34_v3, %s266_s29 }
  0x8c   :  { %v36_v4 = vpop.permute.xlu0 %35 }
  0x8d   :  { %v37_v5 = vsel %vm31_vm0, %v36_v4, %v30_v1 }
  0x8e   :  { %40 = vrot.lane.b32.xlu1 %v37_v5, %s266_s29 }
  0x8f   :  { %178 = shalt.err (!%p175_p12)
}
  0x90   :  { %s179_s8 = scalar_lea.hbm %s387_s2, 256 }
  0x91   :  { %p180_p13 = scmp.ne.s32.totalorder %s387_s2, %s179_s8  ;;  %p183_p0 = scmp.lt.u32.totalorder %s179_s8, %s387_s2 }
  0x93   :  { %p185_p1 = pnand %p183_p0, %p180_p13 }
  0x95   :  { %188 = shalt.err (!%p185_p1)
}
  0x96   :  { %94 = dma.vmem_to_hbm [thread:$0]  %s89_s30, 256, %s387_s2, [#allocation7], %s264_s25, %s264_s25, %s265_s26   ;;  %69 = vst.msk [vmem:[#allocation9] sm:$0xff] %vm52_vm1, %v67_v8  ;;  %70 = vst.msk [vmem:[#allocation9 + $0x8] sm:$0xff] %vm52_vm1, %v68_v9 }
  0x97   :  { %s268_s15 = smov [#allocation9]   ;;  %s269_s17 = smov 113  }
  0x98   :  { %s112_s16 = sshll.u32 %s268_s15, 4  ;;  %s113_s16 = int_to_ptr.vmem [resolvable:$true] %s112_s16 }
  0x99   :  { %s189_s18 = scalar_lea.vmem %s113_s16, 256  ;;  %p194_p3 = scmp.lt.s32.totalorder %s113_s16, %s113_s16 }
  0x9a   :  { %p190_p2 = scmp.ne.s32.totalorder %s113_s16, %s189_s18  ;;  %p195_p4 = scmp.lt.s32.totalorder %s189_s18, %s189_s18 }
  0x9c   :  { %p196_p5 = por %p195_p4, %p194_p3 }
  0x9e   :  { %p197_p6 = pnand %p196_p5, %p190_p2 }
  0xfc   :  { %v39_v10 = vpop.permute.xlu1 %38 }
  0xfd   :  { %v42_v11 = vsel %vm31_vm0, %v39_v10, %v29_v0 }
  0xfe   :  { %46 = vrot.lane.b32.xlu0 %v42_v11, %s269_s17 }
  0xff   :  { %200 = shalt.err (!%p197_p6)
}
 0x100   :  { %s201_s20 = scalar_lea.hbm %s389_s4, 256 }
 0x101   :  { %p202_p7 = scmp.ne.s32.totalorder %s389_s4, %s201_s20  ;;  %p205_p8 = scmp.lt.u32.totalorder %s201_s20, %s389_s4 }
 0x103   :  { %p207_p9 = pnand %p205_p8, %p202_p7 }
 0x105   :  { %210 = shalt.err (!%p207_p9)
}
 0x106   :  { %118 = dma.vmem_to_hbm [thread:$0]  %s113_s16, 256, %s389_s4, [#allocation10], %s264_s25, %s264_s25, %s265_s26   ;;  %v41_v12 = vpop.permute.xlu1 %40 }
 0x107   :  { %v43_v13 = vsel %vm31_vm0, %v41_v12, %v30_v1  ;;  %s270_s29 = smov 127   ;;  %s271_s0 = smov [#allocation5]  }
 0x108   :  { %59 = vrot.lane.b32.xlu0 %v42_v11, %s270_s29  ;;  %48 = vrot.lane.b32.xlu1 %v43_v13, %s269_s17  ;;  %s76_s30 = sshll.u32 %s271_s0, 4  ;;  %s272_s5 = smov [#allocation8]   ;;  %s77_s30 = int_to_ptr.vmem [resolvable:$true] %s76_s30 }
 0x109   :  { %s100_s6 = sshll.u32 %s272_s5, 4  ;;  %s211_s4 = scalar_lea.vmem %s77_s30, 256  ;;  %s101_s6 = int_to_ptr.vmem [resolvable:$true] %s100_s6 }
 0x10a   :  { %p212_p10 = scmp.ne.s32.totalorder %s77_s30, %s211_s4  ;;  %p216_p11 = scmp.lt.s32.totalorder %s77_s30, %s77_s30 }
 0x10b   :  { %p217_p12 = scmp.lt.s32.totalorder %s211_s4, %s211_s4 }
 0x10c   :  { %61 = vrot.lane.b32.xlu1 %v43_v13, %s270_s29 }
 0x10d   :  { %p218_p13 = por %p217_p12, %p216_p11 }
 0x10f   :  { %p219_p0 = pnand %p218_p13, %p212_p10 }
 0x170   :  { %v47_v14 = vpop.permute.xlu0 %46 }
 0x171   :  { %53 = vst.msk [vmem:[#allocation5] sm:$0xff] %vm52_vm1, %v47_v14 }
 0x17a   :  { %v49_v15 = vpop.permute.xlu1 %48  ;;  %v60_v16 = vpop.permute.xlu0 %59 }
 0x17b   :  { %54 = vst.msk [vmem:[#allocation5 + $0x8] sm:$0xff] %vm52_vm1, %v49_v15  ;;  %65 = vst.msk [vmem:[#allocation8] sm:$0xff] %vm52_vm1, %v60_v16 }
 0x17c   :  { %222 = shalt.err (!%p219_p0)
}
 0x17d   :  { %s223_s9 = scalar_lea.hbm %s386_s1, 256 }
 0x17e   :  { %p224_p1 = scmp.ne.s32.totalorder %s386_s1, %s223_s9  ;;  %p227_p2 = scmp.lt.u32.totalorder %s223_s9, %s386_s1 }
 0x180   :  { %p229_p3 = pnand %p227_p2, %p224_p1 }
 0x182   :  { %232 = shalt.err (!%p229_p3)
}
 0x183   :  { %82 = dma.vmem_to_hbm [thread:$0]  %s77_s30, 256, %s386_s1, [#allocation4], %s264_s25, %s264_s25, %s265_s26   ;;  %v62_v17 = vpop.permute.xlu1 %61 }
 0x184   :  { %66 = vst.msk [vmem:[#allocation8 + $0x8] sm:$0xff] %vm52_vm1, %v62_v17  ;;  %s233_s16 = scalar_lea.vmem %s101_s6, 256  ;;  %p238_p5 = scmp.lt.s32.totalorder %s101_s6, %s101_s6 }
 0x185   :  { %p234_p4 = scmp.ne.s32.totalorder %s101_s6, %s233_s16  ;;  %p239_p6 = scmp.lt.s32.totalorder %s233_s16, %s233_s16 }
 0x187   :  { %p240_p7 = por %p239_p6, %p238_p5 }
 0x189   :  { %p241_p8 = pnand %p240_p7, %p234_p4 }
 0x18b   :  { %244 = shalt.err (!%p241_p8)
}
 0x18c   :  { %s245_s2 = scalar_lea.hbm %s388_s3, 256 }
 0x18d   :  { %p246_p9 = scmp.ne.s32.totalorder %s388_s3, %s245_s2  ;;  %p249_p10 = scmp.lt.u32.totalorder %s245_s2, %s388_s3 }
 0x18f   :  { %p251_p11 = pnand %p249_p10, %p246_p9 }
 0x191   :  { %254 = shalt.err (!%p251_p11)
}
 0x192   :  { %106 = dma.vmem_to_hbm [thread:$0]  %s101_s6, 256, %s388_s3, [#allocation7], %s264_s25, %s264_s25, %s265_s26  }
 0x193   :  { %257 = dma.done.wait [#allocation4], 256  }
 0x194   :  { %258 = vsyncadd [#allocation4], 4294967040 }
 0x195   :  { %259 = dma.done.wait [#allocation7], 512  }
 0x196   :  { %260 = vsyncadd [#allocation7], 4294966784 }
 0x197   :  { %261 = dma.done.wait [#allocation10], 256  }
 0x198   :  { %262 = vsyncadd [#allocation10], 4294967040 }
 0x199   :  { %131 = vsyncpa [#allocation3], 1 }
 0x19a   :  { %132 = vsyncpa [#allocation4], 1 }
 0x19b   :  { %133 = vsyncpa [#allocation7], 1 }
 0x19c   :  { %134 = vsyncpa [#allocation10], 1 }

// kernel: tpu_custom_call.1
= control target key start
LH: loop header
LB: loop body
LE: loop exit
PB: predicated region body
PF: predicated region fallthrough
CT: control target
= control target key end

     0   :  { %s1499_s0 = inlined_call_operand.hbm [shape: f32[2,16,16], index: 0, kind: input, shape index: {}]   ;;  %s1500_s1 = inlined_call_operand.hbm [shape: f32[2,16,16], index: 1, kind: input, shape index: {}]   ;;  %s1501_s2 = inlined_call_operand.vmem [shape: f32[2,1,2,16], index: 2, kind: input, shape index: {}]   ;;  %s1502_s3 = inlined_call_operand.vmem [shape: f32[2,1,2,16], index: 3, kind: input, shape index: {}]   ;;  %s1503_s4 = inlined_call_operand.hbm [shape: bf16[2,16,16], index: 4, kind: input, shape index: {}]   ;;  %s1504_s5 = inlined_call_operand.hbm [shape: f32[2,1,8,128], index: 5, kind: output, shape index: {}]  }
   0x1   :  { %1513 = sst [smem:[#allocation15_spill]] %s1499_s0 }
   0x2   :  { %1514 = sst [smem:[#allocation16_spill]] %s1500_s1 }
   0x3   :  { %10 = vsyncpa [#allocation3], 0 }
   0x4   :  { %12 = vsyncpa [#allocation3 + $0x1], 0 }
   0x5   :  { %13 = vsyncpa [#allocation6], 0 }
   0x6   :  { %15 = vsyncpa [#allocation6 + $0x1], 0 }
   0x7   :  { %16 = vsyncpa [#allocation4], 0 }
   0x8   :  { %18 = vsyncpa [#allocation4 + $0x1], 0  ;;  %s1161_s18 = smov 0   ;;  %s1163_s19 = smov 0  }
   0x9   :  { %s1165_s20 = smov 0   ;;  %s1167_s21 = smov 0  }
   0xa   :  { %s1169_s22 = smov 0   ;;  %s1171_s23 = smov 0  }
   0xb LB: > { %1515 = sst [smem:[#allocation12_spill]] %s1107_s20  ;;  %s1192_s24 = sadd.s32 4294967295, %s1119_s23   ;;  %s1119_s23 = sphi %s1171_s23, %s24_s23   ;;  %s1115_s22 = sphi %s1169_s22, %s1544_s22   ;;  %s1111_s21 = sphi %s1167_s21, %s1543_s21   ;;  %s1107_s20 = sphi %s1165_s20, %s1539_s20   ;;  %s1103_s19 = sphi %s1163_s19, %s1542_s19   ;;  %s1099_s18 = sphi %s1161_s18, %s1541_s18  }
   0xc   : > { %s823_s25 = sadd.s32 4294967294, %s1119_s23   ;;  %s36_s26 = sadd.s32 1, %s1115_s22 }
   0xd   : > { %s45_s27 = sadd.s32 1, %s1107_s20  ;;  %p38_p0 = scmp.ge.s32.totalorder %s36_s26, 2 }
   0xe   : > { %p52_p1 = scmp.ne.s32.totalorder %s1107_s20, %s1103_s19  ;;  %p53_p2 = scmp.eq.s32.totalorder %s1119_s23, 0 }
   0xf   : > { %p58_p3 = scmp.ne.s32.totalorder %s1103_s19, %s1099_s18  ;;  %s1546_s26 = smov (%p38_p0, %s36_s26), 0 }
  0x10   : > { %1516 = sst [smem:[#allocation13_spill]] %s1546_s26  ;;  %p1204_p4 = por %p53_p2, %p52_p1 }
  0x11   : > { %p59_p5 = scmp.eq.s32.totalorder %s1192_s24, 0  ;;  %s40_s29 = ssub.s32 %s1115_s22, %s1546_s26 }
  0x12   : > { %p196_p6 = scmp.eq.s32.totalorder %s1192_s24, 1  ;;  %p43_p7 = scmp.eq.s32.totalorder %s40_s29, 0 }
  0x13   : > { %p1212_p8 = por %p59_p5, %p58_p3  ;;  %p202_p10 = scmp.eq.s32.totalorder %s823_s25, 1 }
  0x14   : > { %p1216_p9 = por %p196_p6, %p52_p1  ;;  %p879_p13 = scmp.lt.s32.totalorder %s1119_s23, 2 }
  0x15   : > { %s1518_s30 = scalar_select %p1212_p8, 1, 0 }
  0x16   : > { %s1519_s6 = scalar_select %p1216_p9, 1, 0 }
  0x17   : > { %s1221_s7 = scalar_select %p43_p7, %s1107_s20, %s45_s27  }
  0x18   : > { %p1223_p11 = por %p202_p10, %p58_p3  ;;  %s1230_s9 = sand.u32 1, %s1107_s20  }
  0x19   : > { %1520 = sst [smem:[#allocation14_spill]] %s1221_s7  ;;  %s1505_s10 = sshll.u32 %s1230_s9, 4 }
  0x1a   : > { %s1521_s8 = scalar_select %p1223_p11, 1, 0 }
  0x1b   : > { %s1506_s11 = sshll.u32 %s1115_s22, 8  ;;  %p1236_p0 = pnand %p879_p13, %p1204_p4 }
  0x1c   : > { %s245_s13 = sand.u32 1, %s1119_s23   ;;  %s1523_s1 = sld [smem:[#allocation16_spill]] }
  0x1d   : > { %s249_s17 = scalar_lea.vmem [#allocation5], %s1505_s10  ;;  %s1254_s27 = scalar_lea.sflag [#allocation6], %s245_s13 }
  0x1e   : > { %s258_s25 = sshll.u32 %s249_s17, 4  ;;  %p1260_p4 = pneg %p1236_p0  ;;  %s1251_s25 = int_to_ptr.vmem [resolvable:$true] %s258_s25 }
  0x22   : > { %s1246_s16 = scalar_lea.hbm %s1523_s1, %s1506_s11  ;;  %s948_s17 = scalar_lea.hbm %s1523_s1, 512 }
  0x23   : > { %s943_s28 = scalar_lea.hbm %s1246_s16, 256  ;;  %p949_p7 = scmp.lt.u32.totalorder %s1246_s16, %s1523_s1 }
  0x24   : > { %p944_p3 = scmp.ne.s32.totalorder %s1246_s16, %s943_s28  ;;  %p950_p10 = scmp.lt.u32.totalorder %s948_s17, %s943_s28 }
  0x25   : > { %p952_p12 = scmp.lt.u32.totalorder %s943_s28, %s1246_s16 }
  0x26   : > { %p946_p5 = pnand %p1260_p4, %p944_p3  ;;  %p951_p13 = por %p950_p10, %p949_p7 }
  0x28   : > { %p947_p6 = pneg %p946_p5  ;;  %p953_p1 = por %p952_p12, %p951_p13 }
  0x2a   : > { %p954_p2 = pnand %p953_p1, %p947_p6 }
  0x2c   : > { %957 = shalt.err (!%p954_p2)
}
  0x2d   : > { %s958_s13 = scalar_lea.vmem %s1251_s25, 256  ;;  %s1121_s14 = smov [#allocation5]  }
  0x2e   : > { %p959_p3 = scmp.ne.s32.totalorder %s1251_s25, %s958_s13  ;;  %s963_s15 = sshll.u32 %s1121_s14, 4  ;;  %s964_s15 = int_to_ptr.vmem [resolvable:$false] %s963_s15 }
  0x2f   : > { %s965_s10 = scalar_lea.vmem %s964_s15, 512  ;;  %p966_p9 = scmp.lt.s32.totalorder %s1251_s25, %s964_s15 }
  0x30   : > { %p961_p5 = pnand %p959_p3, %p1260_p4  ;;  %p967_p8 = scmp.lt.s32.totalorder %s965_s10, %s958_s13 }
  0x32   : > { %p962_p11 = pneg %p961_p5  ;;  %p968_p7 = por %p967_p8, %p966_p9 }
  0x34   : > { %p969_p10 = pnand %p968_p7, %p962_p11 }
  0x36   : > { %972 = shalt.err (!%p969_p10)
}
  0x37   : > { %s1510_s11 = smov 128   ;;  %s1511_s28 = smov 8  }
  0x38   : > { %871 = dma.hbm_to_vmem [thread:$0]  (!%p1236_p0), %s1246_s16, 256, %s1251_s25, %s1254_s27, %s1510_s11, %s1510_s11, %s1511_s28  }
  0x39   : > { %p1525_p8 = scmp.lt.s32.totalorder %s1119_s23, 3  ;;  %p1526_p9 = scmp.ge.s32.totalorder %s1119_s23, 1 }
  0x3a   : > { %s1528_s13 = sshll.u32 %s1115_s22, 8  ;;  %s1529_s0 = sld [smem:[#allocation15_spill]] }
  0x3b   : > { %p1291_p11 = pnand %p1526_p9, %p1525_p8  ;;  %s1530_s1 = sshll.u32 %s1230_s9, 4 }
  0x3c   : > { %s226_s26 = scalar_lea.vmem [#allocation2], %s1530_s1  ;;  %s832_s16 = sshll.u32 %s1230_s9, 3 }
  0x3d   : > { %s1527_s17 = scalar_select %p1291_p11, 1, 0 }
  0x3e   : > { %s235_s7 = sshll.u32 %s226_s26, 4  ;;  %s223_s25 = scalar_lea.sflag [#allocation3], %s1230_s9  ;;  %s1305_s7 = int_to_ptr.vmem [resolvable:$true] %s235_s7 }
  0x40   : > { %s1300_s10 = scalar_lea.hbm %s1529_s0, %s1528_s13  ;;  %s978_s13 = scalar_lea.hbm %s1529_s0, 512 }
  0x41   : > { %s973_s11 = scalar_lea.hbm %s1300_s10, 256  ;;  %p979_p6 = scmp.lt.u32.totalorder %s1300_s10, %s1529_s0 }
  0x42   : > { %p974_p12 = scmp.ne.s32.totalorder %s1300_s10, %s973_s11  ;;  %p980_p13 = scmp.lt.u32.totalorder %s978_s13, %s973_s11 }
  0x43   : > { %p982_p5 = scmp.lt.u32.totalorder %s973_s11, %s1300_s10 }
  0x44   : > { %p976_p1 = pnand %p974_p12, %p1260_p4  ;;  %p981_p3 = por %p980_p13, %p979_p6 }
  0x46   : > { %p977_p2 = pneg %p976_p1  ;;  %p983_p7 = por %p982_p5, %p981_p3 }
  0x48   : > { %p984_p10 = pnand %p983_p7, %p977_p2 }
  0x4a   : > { %987 = shalt.err (!%p984_p10)
}
  0x4b   : > { %s988_s1 = scalar_lea.vmem %s1305_s7, 256  ;;  %s1124_s26 = smov [#allocation2]  }
  0x4c   : > { %p989_p8 = scmp.ne.s32.totalorder %s1305_s7, %s988_s1  ;;  %s993_s28 = sshll.u32 %s1124_s26, 4  ;;  %s994_s28 = int_to_ptr.vmem [resolvable:$false] %s993_s28 }
  0x4d   : > { %s995_s20 = scalar_lea.vmem %s994_s28, 512  ;;  %p996_p1 = scmp.lt.s32.totalorder %s1305_s7, %s994_s28 }
  0x4e   : > { %p991_p9 = pnand %p989_p8, %p1260_p4  ;;  %p997_p11 = scmp.lt.s32.totalorder %s995_s20, %s988_s1 }
  0x50   : > { %p992_p12 = pneg %p991_p9  ;;  %p998_p6 = por %p997_p11, %p996_p1 }
  0x52   : > { %p999_p13 = pnand %p998_p6, %p992_p12 }
  0x54   : > { %1002 = shalt.err (!%p999_p13)
}
  0x55   : > { %s1531_s11 = smov 8   ;;  %s1532_s14 = smov 128  }
  0x56   : > { %868 = dma.hbm_to_vmem [thread:$0]  (!%p1236_p0), %s1300_s10, 256, %s1305_s7, %s223_s25, %s1532_s14, %s1532_s14, %s1531_s11  }
  0x57   : > { %s848_s13 = sshll.u32 %s1115_s22, 7  ;;  %s292_s15 = scalar_lea.vmem [#allocation7], %s832_s16 }
  0x58   : > { %s301_s1 = sshll.u32 %s292_s15, 4  ;;  %s1340_s20 = scalar_lea.hbm %s1503_s4, %s848_s13  ;;  %s1342_s1 = int_to_ptr.vmem [resolvable:$true] %s301_s1 }
  0x59   : > { %s1003_s0 = scalar_lea.hbm %s1340_s20, 128  ;;  %s1008_s10 = scalar_lea.hbm %s1503_s4, 256 }
  0x5a   : > { %p1004_p11 = scmp.ne.s32.totalorder %s1340_s20, %s1003_s0  ;;  %p1009_p5 = scmp.lt.u32.totalorder %s1340_s20, %s1503_s4 }
  0x5b   : > { %p1010_p7 = scmp.lt.u32.totalorder %s1008_s10, %s1003_s0  ;;  %p1012_p8 = scmp.lt.u32.totalorder %s1003_s0, %s1340_s20 }
  0x5c   : > { %p1006_p2 = pnand %p1004_p11, %p1260_p4 }
  0x5d   : > { %p1011_p10 = por %p1010_p7, %p1009_p5 }
  0x5e   : > { %p1007_p3 = pneg %p1006_p2 }
  0x5f   : > { %p1013_p9 = por %p1012_p8, %p1011_p10 }
  0x61   : > { %p1014_p12 = pnand %p1013_p9, %p1007_p3 }
  0x63   : > { %1017 = shalt.err (!%p1014_p12)
}
  0x64   : > { %s1018_s11 = scalar_lea.vmem %s1342_s1, 128  ;;  %s1125_s14 = smov [#allocation7]  }
  0x65   : > { %p1019_p1 = scmp.ne.s32.totalorder %s1342_s1, %s1018_s11  ;;  %s1023_s13 = sshll.u32 %s1125_s14, 4  ;;  %s1024_s13 = int_to_ptr.vmem [resolvable:$false] %s1023_s13 }
  0x66   : > { %s1025_s15 = scalar_lea.vmem %s1024_s13, 256  ;;  %p1026_p11 = scmp.lt.s32.totalorder %s1342_s1, %s1024_s13 }
  0x67   : > { %p1021_p6 = pnand %p1019_p1, %p1260_p4  ;;  %p1027_p2 = scmp.lt.s32.totalorder %s1025_s15, %s1018_s11 }
  0x69   : > { %p1022_p13 = pneg %p1021_p6  ;;  %p1028_p5 = por %p1027_p2, %p1026_p11 }
  0x6b   : > { %p1029_p7 = pnand %p1028_p5, %p1022_p13 }
  0x6d   : > { %1032 = shalt.err (!%p1029_p7)
}
  0x6e   : > { %s1126_s0 = smov 64   ;;  %s1127_s26 = smov 4  }
  0x6f   : > { %874 = dma.hbm_to_vmem [thread:$0]  (!%p1236_p0), %s1340_s20, 128, %s1342_s1, %s1254_s27, %s1126_s0, %s1126_s0, %s1127_s26  }
  0x70   : > { %p1533_p4 = scmp.ne.s32.totalorder %s1527_s17, 0 }
  0x71   : > { %s1369_s29 = sand.u32 (!%p1533_p4), 1, %s1103_s19   ;;  %p1534_p3 = scmp.ne.s32.totalorder (!%p1533_p4), %s1518_s30, 0 }
  0x72   : > { %313 = sbr.rel (%p1533_p4) target bundleno = 534 (0x216), region = 40  ;;  %s836_s28 = sshll.u32 (!%p1533_p4), %s1369_s29, 4 }
  0x73   : > { %s316_s7 = scalar_lea.sflag (!%p1533_p4), [#allocation3], %s1369_s29  ;;  %s319_s9 = scalar_lea.vmem (!%p1533_p4), [#allocation2], %s836_s28 }
  0x79   : > { %1086 = dma.done.wait (%p1534_p3), %s316_s7, 256  }
  0x7a   : > { %1088 = vsyncadd (%p1534_p3), %s316_s7, 4294967040  ;;  %s324_s12 = sand.u32 1, %s1192_s24   ;;  %s328_s17 = scalar_lea.vmem [#allocation5], %s836_s28 }
  0x7b   : > { %s325_s27 = scalar_lea.sflag [#allocation6], %s324_s12 }
  0x7c   : > { %1090 = dma.done.wait (%p1534_p3), %s325_s27, 384  }
  0x7d   : > { %1092 = vsyncadd (%p1534_p3), %s325_s27, 4294966912  ;;  %p390_p0 = scmp.lt.s32.totalorder %s1111_s21, 1  ;;  %v407_v0 = vld [vmem:[%s328_s17] sm:$0xff]  ;;  %v408_v1 = vld [vmem:[%s328_s17 + $0x8] sm:$0xff]  ;;  %vm412_vm0 = vcmask 1046528   ;;  %vm422_vm1 = vcmask 1040384  }
  0x7e   : > { %v508_v3 = vrot.slane %v407_v0, 1  ;;  %v509_v4 = vrot.slane %v408_v1, 1  ;;  %v517_v6 = vrot.slane %v407_v0, 7  ;;  %v405_v7 = vld [vmem:[%s319_s9] sm:$0xff]  ;;  %v406_v8 = vld [vmem:[%s319_s9 + $0x8] sm:$0xff]  ;;  %v518_v13 = vrot.slane %v408_v1, 7 }
  0x7f   : > { %s391_s1 = scalar_select %p390_p0, %s1111_s21, 1  ;;  %v413_v10 = vrot.slane %v405_v7, 1  ;;  %v414_v11 = vrot.slane %v406_v8, 1  ;;  %v423_v12 = vrot.slane %v405_v7, 7  ;;  %v424_v24 = vrot.slane %v406_v8, 7 }
  0x80   : > { %v510_v14 = vsel %vm412_vm0, %v508_v3, %v509_v4  ;;  %v519_v21 = vsel %vm422_vm1, %v517_v6, %v518_v13  ;;  %s1128_s30 = smov 1   ;;  %v430_v26 = vmul.f32 2.0, %v406_v8  ;;  %v429_v27 = vmul.f32 2.0, %v405_v7  ;;  %s1129_s13 = smov 127  }
  0x81   : > { %s840_s20 = sshll.u32 %s391_s1, 1  ;;  %v415_v19 = vsel %vm412_vm0, %v413_v10, %v414_v11  ;;  %v425_v28 = vsel %vm422_vm1, %v423_v12, %v424_v24  ;;  %v524_v34 = vmul.f32 2.0, %v408_v1  ;;  %v523_v35 = vmul.f32 2.0, %v407_v0  ;;  %s838_s15 = sshll.u32 %s1369_s29, 3 }
  0x82   : > { %s403_s25 = scalar_lea.vmem %s1502_s3, %s840_s20  ;;  %s396_s24 = scalar_lea.vmem %s1501_s2, %s840_s20  ;;  %v432_v30 = vadd.f32 %v430_v26, %v425_v28  ;;  %vm607_vm2 = vcmask 130048   ;;  %vm454_vm3 = vcmask 7168   ;;  %vm445_vm4 = vcmask 121856  }
  0x83   : > { %v505_v2 = vld [vmem:[%s403_s25] sm:$0x3]  ;;  %v526_v36 = vadd.f32 %v524_v34, %v519_v21  ;;  %s337_s0 = scalar_lea.vmem [#allocation7], %s838_s15  ;;  %s843_s26 = sshll.u32 %s1111_s21, 7 }
  0x84   : > { %v514_v5 = vrot.slane %v505_v2, 2  ;;  %v409_v9 = vld [vmem:[%s396_s24] sm:$0x3]  ;;  %v522_v15 = vsel %vm422_vm1, %v505_v2, %v517_v6  ;;  %s387_s7 = scalar_lea.vmem [#allocation8], %s838_s15  ;;  %s1450_s1 = scalar_lea.hbm %s1504_s5, %s843_s26 }
  0x85   : > { %v419_v16 = vrot.slane %v409_v9, 2  ;;  %v1393_v18 = vsub.f32 %v510_v14, %v522_v15  ;;  %v428_v20 = vsel %vm422_vm1, %v409_v9, %v423_v12  ;;  %v525_v37 = vadd.f32 %v523_v35, %v522_v15  ;;  %v1409_v40 = vld [vmem:[%s337_s0] sm:$0xff]   ;;  %s661_s9 = sshll.u32 %s387_s7, 4  ;;  %s647_s21 = scalar_lea.sflag [#allocation4], %s1369_s29  ;;  %s1452_s9 = int_to_ptr.vmem [resolvable:$true] %s661_s9 }
  0x86   : > { %v516_v17 = vsel %vm412_vm0, %v509_v4, %v514_v5  ;;  %v435_v22 = vsub.f32 %v415_v19, %v428_v20  ;;  %v431_v31 = vadd.f32 %v429_v27, %v428_v20  ;;  %v851_v41 = vunpack.c.l.bf16 %v1409_v40  ;;  %s1033_s20 = scalar_lea.vmem %s1452_s9, 128  ;;  %p1535_p8 = scmp.ne.s32.totalorder %s1519_s6, 0 }
  0x87   : > { %v421_v23 = vsel %vm412_vm0, %v414_v11, %v419_v16  ;;  %553 = vrot.lane.b32.xlu1 %v1393_v18, %s1128_s30  ;;  %v1400_v25 = vsub.f32 %v516_v17, %v519_v21  ;;  %v528_v38 = vadd.f32 %v526_v36, %v516_v17  ;;  %v527_v39 = vadd.f32 %v525_v37, %v510_v14  ;;  %p1034_p10 = scmp.ne.s32.totalorder %s1452_s9, %s1033_s20  ;;  %s1130_s10 = smov [#allocation8]  }
  0x88   : > { %461 = vrot.lane.b32.xlu0 %v435_v22, %s1128_s30  ;;  %v436_v29 = vsub.f32 %v421_v23, %v425_v28  ;;  %v434_v32 = vadd.f32 %v432_v30, %v421_v23  ;;  %v433_v33 = vadd.f32 %v431_v31, %v415_v19  ;;  %v852_v42 = vunpack.c.h.bf16 %v1409_v40  ;;  %s1037_s16 = sshll.u32 %s1130_s10, 4  ;;  %s1038_s16 = int_to_ptr.vmem [resolvable:$false] %s1037_s16 }
  0x89   : > { %v620_v43 = vsel %vm607_vm2, %v851_v41, 0.0  ;;  %v469_v54 = vmul.f32 2.0, %v435_v22  ;;  %v562_v14 = vmul.f32 2.0, %v1400_v25  ;;  %v561_v17 = vmul.f32 2.0, %v1393_v18  ;;  %p1035_p9 = pnand %p1034_p10, %p1535_p8  ;;  %s1039_s25 = scalar_lea.vmem %s1038_s16, 256 }
  0x8a   : > { %v621_v44 = vsel %vm607_vm2, %v852_v42, 0.0  ;;  %v470_v52 = vmul.f32 2.0, %v436_v29  ;;  %p1040_p1 = scmp.lt.s32.totalorder %s1452_s9, %s1038_s16  ;;  %p1041_p6 = scmp.lt.s32.totalorder %s1039_s25, %s1033_s20 }
  0x8b   : > { %555 = vrot.lane.b32.xlu1 %v1400_v25, %s1128_s30  ;;  %v622_v45 = vadd.f32 %v621_v44, %v620_v43  ;;  %p1036_p12 = pneg %p1035_p9 }
  0x8c   : > { %463 = vrot.lane.b32.xlu0 %v436_v29, %s1128_s30  ;;  %p1042_p13 = por %p1041_p6, %p1040_p1 }
  0x8e   : > { %p1043_p11 = pnand %p1042_p13, %p1036_p12 }
  0x8f   : > { %441 = vrot.lane.b32.xlu1 %v434_v32, %s1129_s13 }
  0x90   : > { %439 = vrot.lane.b32.xlu0 %v433_v33, %s1129_s13 }
  0x93   : > { %450 = vrot.lane.b32.xlu1 %v434_v32, %s1128_s30 }
  0x94   : > { %448 = vrot.lane.b32.xlu0 %v433_v33, %s1128_s30 }
  0x97   : > { %475 = vrot.lane.b32.xlu1 %v436_v29, %s1129_s13 }
  0x98   : > { %473 = vrot.lane.b32.xlu0 %v435_v22, %s1129_s13 }
  0x9b   : > { %535 = vrot.lane.b32.xlu1 %v528_v38, %s1129_s13 }
  0x9c   : > { %533 = vrot.lane.b32.xlu0 %v527_v39, %s1129_s13 }
  0x9f   : > { %543 = vrot.lane.b32.xlu1 %v528_v38, %s1128_s30 }
  0xa0   : > { %541 = vrot.lane.b32.xlu0 %v527_v39, %s1128_s30 }
  0xa3   : > { %567 = vrot.lane.b32.xlu1 %v1400_v25, %s1129_s13 }
  0xa4   : > { %565 = vrot.lane.b32.xlu0 %v1393_v18, %s1129_s13 }
  0xc7   : > { %623 = vadd.xlane.f32.xlu1 %v622_v45 }
  0xf9   : > { %v554_v46 = vpop.permute.xlu1 %553 }
  0xfa   : > { %v462_v47 = vpop.permute.xlu0 %461  ;;  %v559_v23 = vsel %vm454_vm3, 0.0, %v554_v46 }
  0xfb   : > { %v467_v57 = vsel %vm454_vm3, 0.0, %v462_v47  ;;  %v563_v31 = vadd.f32 %v561_v17, %v559_v23 }
  0xfc   : > { %v471_v62 = vadd.f32 %v469_v54, %v467_v57 }
  0xfd   : > { %v556_v48 = vpop.permute.xlu1 %555 }
  0xfe   : > { %v464_v49 = vpop.permute.xlu0 %463  ;;  %v560_v19 = vsel %vm454_vm3, 0.0, %v556_v48 }
  0xff   : > { %v468_v55 = vsel %vm454_vm3, 0.0, %v464_v49  ;;  %v564_v27 = vadd.f32 %v562_v14, %v560_v19 }
 0x100   : > { %v472_v59 = vadd.f32 %v470_v52, %v468_v55 }
 0x101   : > { %v442_v50 = vpop.permute.xlu1 %441 }
 0x102   : > { %v440_v51 = vpop.permute.xlu0 %439  ;;  %v447_v63 = vsel %vm445_vm4, %v442_v50, 0.0 }
 0x103   : > { %v446_v2 = vsel %vm445_vm4, %v440_v51, 0.0 }
 0x105   : > { %v451_v53 = vpop.permute.xlu1 %450 }
 0x106   : > { %v449_v56 = vpop.permute.xlu0 %448  ;;  %v456_v58 = vsel %vm454_vm3, 0.0, %v451_v53 }
 0x107   : > { %v455_v60 = vsel %vm454_vm3, 0.0, %v449_v56  ;;  %v458_v3 = vsub.f32 %v447_v63, %v456_v58 }
 0x108   : > { %v457_v6 = vsub.f32 %v446_v2, %v455_v60 }
 0x109   : > { %v476_v61 = vpop.permute.xlu1 %475  ;;  %v484_v12 = vmul.f32 %v458_v3, %v458_v3 }
 0x10a   : > { %v480_v0 = vsel %vm445_vm4, %v476_v61, 0.0  ;;  %v474_v1 = vpop.permute.xlu0 %473  ;;  %v483_v13 = vmul.f32 %v457_v6, %v457_v6 }
 0x10b   : > { %v482_v4 = vadd.f32 %v480_v0, %v472_v59  ;;  %v479_v5 = vsel %vm445_vm4, %v474_v1, 0.0 }
 0x10c   : > { %v481_v7 = vadd.f32 %v479_v5, %v471_v62 }
 0x10d   : > { %v486_v8 = vmul.f32 %v482_v4, %v482_v4  ;;  %v536_v9 = vpop.permute.xlu1 %535 }
 0x10e   : > { %v485_v10 = vmul.f32 %v481_v7, %v481_v7  ;;  %v534_v11 = vpop.permute.xlu0 %533  ;;  %v540_v26 = vsel %vm445_vm4, %v536_v9, 0.0 }
 0x10f   : > { %v488_v15 = vadd.f32 %v486_v8, %v484_v12  ;;  %v539_v25 = vsel %vm445_vm4, %v534_v11, 0.0 }
 0x110   : > { %v487_v20 = vadd.f32 %v485_v10, %v483_v13 }
 0x111   : > { %v544_v16 = vpop.permute.xlu1 %543  ;;  %v490_v28 = vadd.f32 1e-06, %v488_v15 }
 0x112   : > { %v548_v21 = vsel %vm454_vm3, 0.0, %v544_v16  ;;  %v542_v22 = vpop.permute.xlu0 %541  ;;  %v489_v18 = vadd.f32 1e-06, %v487_v20 }
 0x113   : > { %v547_v24 = vsel %vm454_vm3, 0.0, %v542_v22  ;;  %v550_v29 = vsub.f32 %v540_v26, %v548_v21  ;;  %935 = vrsqrt.f32 %v490_v28  ;;  %vm500_vm7 = vcmp.eq.f32.partialorder %v490_v28, inf }
 0x114   : > { %v549_v32 = vsub.f32 %v539_v25, %v547_v24  ;;  %937 = vrsqrt.f32 %v489_v18  ;;  %vm493_vm5 = vcmp.eq.f32.partialorder %v489_v18, inf  ;;  %vm495_vm6 = vcmp.eq.f32.partialorder %v489_v18, 0.0 }
 0x115   : > { %v568_v30 = vpop.permute.xlu1 %567  ;;  %v576_v38 = vmul.f32 %v550_v29, %v550_v29  ;;  %v496_v54 = vand.u32 2147483648, %v489_v18  ;;  %vm502_vm8 = vcmp.eq.f32.partialorder %v490_v28, 0.0  ;;  %v503_v57 = vand.u32 2147483648, %v490_v28 }
 0x116   : > { %v572_v33 = vsel %vm445_vm4, %v568_v30, 0.0  ;;  %v566_v34 = vpop.permute.xlu0 %565  ;;  %v575_v43 = vmul.f32 %v549_v32, %v549_v32 }
 0x117   : > { %v574_v35 = vadd.f32 %v572_v33, %v564_v27  ;;  %v571_v36 = vsel %vm445_vm4, %v566_v34, 0.0  ;;  %v632_v27 = vlaneseq }
 0x118   : > { %v573_v37 = vadd.f32 %v571_v36, %v563_v31 }
 0x119   : > { %v578_v39 = vmul.f32 %v574_v35, %v574_v35  ;;  %v635_v25 = vand.u32 127, %v632_v27 }
 0x11a   : > { %v577_v44 = vmul.f32 %v573_v37, %v573_v37 }
 0x11b   : > { %v580_v45 = vadd.f32 %v578_v39, %v576_v38  ;;  %vm639_vm14 = vcmp.eq.s32.totalorder %v635_v25, 1  ;;  %vm637_vm15 = vcmp.eq.s32.totalorder %v635_v25, 0 }
 0x11c   : > { %v579_v46 = vadd.f32 %v577_v44, %v575_v43 }
 0x11d   : > { %v582_v47 = vadd.f32 1e-06, %v580_v45  ;;  %v936_v49 = vpop.eup %935 }
 0x11e   : > { %v581_v48 = vadd.f32 1e-06, %v579_v46  ;;  %v938_v50 = vpop.eup %937  ;;  %v499_v51 = vmul.f32 %v936_v49, %v490_v28 }
 0x11f   : > { %939 = vrsqrt.f32 %v582_v47  ;;  %v492_v52 = vmul.f32 %v938_v50, %v489_v18  ;;  %vm592_vm9 = vcmp.eq.f32.partialorder %v582_v47, inf  ;;  %v595_v61 = vand.u32 2147483648, %v582_v47 }
 0x120   : > { %941 = vrsqrt.f32 %v581_v48  ;;  %v501_v56 = vsel %vm500_vm7, %v490_v28, %v499_v51  ;;  %vm585_vm10 = vcmp.eq.f32.partialorder %v581_v48, inf  ;;  %v588_v62 = vand.u32 2147483648, %v581_v48 }
 0x121   : > { %v494_v59 = vsel %vm493_vm5, %v489_v18, %v492_v52  ;;  %vm594_vm11 = vcmp.eq.f32.partialorder %v582_v47, 0.0  ;;  %v504_v0 = vsel %vm502_vm8, %v503_v57, %v501_v56  ;;  %vm587_vm12 = vcmp.eq.f32.partialorder %v581_v48, 0.0 }
 0x122   : > { %v497_v3 = vsel %vm495_vm6, %v496_v54, %v494_v59  ;;  %v633_v28 = vshrl.u32 %v632_v27, 7 }
 0x124   : > { %vm636_vm13 = vcmp.eq.s32.totalorder %v633_v28, 0 }
 0x125   : > { %vm640_vm0 = vmand %vm636_vm13, %vm639_vm14 }
 0x126   : > { %vm638_vm1 = vmand %vm636_vm13, %vm637_vm15 }
 0x129   : > { %v940_v53 = vpop.eup %939 }
 0x12a   : > { %v942_v55 = vpop.eup %941  ;;  %v591_v58 = vmul.f32 %v940_v53, %v582_v47 }
 0x12b   : > { %v584_v60 = vmul.f32 %v942_v55, %v581_v48 }
 0x12c   : > { %v593_v63 = vsel %vm592_vm9, %v582_v47, %v591_v58 }
 0x12d   : > { %v586_v1 = vsel %vm585_vm10, %v581_v48, %v584_v60  ;;  %v596_v2 = vsel %vm594_vm11, %v595_v61, %v593_v63 }
 0x12e   : > { %v589_v4 = vsel %vm587_vm12, %v588_v62, %v586_v1  ;;  %v598_v5 = vsub.f32 %v504_v0, %v596_v2 }
 0x12f   : > { %v597_v6 = vsub.f32 %v497_v3, %v589_v4 }
 0x130   : > { %v600_v7 = vand.u32 2147483647, %v598_v5 }
 0x131   : > { %v599_v8 = vand.u32 2147483647, %v597_v6 }
 0x132   : > { %v606_v9 = vmul.f32 %v852_v42, %v600_v7 }
 0x133   : > { %v605_v10 = vmul.f32 %v851_v41, %v599_v8 }
 0x134   : > { %v609_v11 = vsel %vm607_vm2, %v606_v9, 0.0 }
 0x135   : > { %v608_v12 = vsel %vm607_vm2, %v605_v10, 0.0 }
 0x136   : > { %v610_v13 = vadd.f32 %v609_v11, %v608_v12 }
 0x138   : > { %611 = vadd.xlane.f32.xlu0 %v610_v13 }
 0x154   : > { %v624_v14 = vpop.xlane.xlu1 %623 }
 0x155   : > { %v625_v15 = vrot.slane %v624_v14, 4 }
 0x157   : > { %v626_v16 = vadd.f32 %v625_v15, %v624_v14 }
 0x159   : > { %v627_v17 = vrot.slane %v626_v16, 2 }
 0x15b   : > { %v628_v22 = vadd.f32 %v627_v17, %v626_v16 }
 0x15d   : > { %v629_v40 = vrot.slane %v628_v22, 1 }
 0x15f   : > { %v630_v26 = vadd.f32 %v629_v40, %v628_v22 }
 0x1c5   : > { %v612_v19 = vpop.xlane.xlu0 %611 }
 0x1c6   : > { %v613_v20 = vrot.slane %v612_v19, 4 }
 0x1c8   : > { %v614_v21 = vadd.f32 %v613_v20, %v612_v19 }
 0x1ca   : > { %v615_v23 = vrot.slane %v614_v21, 2 }
 0x1cc   : > { %v616_v42 = vadd.f32 %v615_v23, %v614_v21 }
 0x1ce   : > { %v617_v41 = vrot.slane %v616_v42, 1 }
 0x1d0   : > { %v618_v24 = vadd.f32 %v617_v41, %v616_v42 }
 0x1d2   : > { %853 = vpush %v618_v24 }
 0x1d3   : > { %855 = vpush %v630_v26 }
 0x203   : > { %s854_s28 = spop %853 }
 0x204   : > { %v643_v29 = vstv %s854_s28  ;;  %s856_s12 = spop %855 }
 0x205   : > { %v641_v30 = vstv %s856_s12 }
 0x206   : > { %v642_v31 = vsel %vm640_vm0, %v641_v30, 0.0 }
 0x207   : > { %v644_v18 = vsel %vm638_vm1, %v643_v29, %v642_v31 }
 0x208   : > { %645 = vst [vmem:[%s387_s7] sm:$0xff] %v644_v18 }
 0x209   : > { %1046 = shalt.err (!%p1043_p11)
}
 0x20a   : > { %s1047_s29 = scalar_lea.hbm %s1450_s1, 128  ;;  %s1051_s24 = scalar_lea.hbm %s1504_s5, 256 }
 0x20b   : > { %p1048_p2 = scmp.ne.s32.totalorder %s1450_s1, %s1047_s29  ;;  %p1052_p4 = scmp.lt.u32.totalorder %s1450_s1, %s1504_s5 }
 0x20c   : > { %p1053_p3 = scmp.lt.u32.totalorder %s1051_s24, %s1047_s29  ;;  %p1055_p10 = scmp.lt.u32.totalorder %s1047_s29, %s1450_s1 }
 0x20d   : > { %p1049_p5 = pnand %p1048_p2, %p1535_p8 }
 0x20e   : > { %p1054_p0 = por %p1053_p3, %p1052_p4 }
 0x20f   : > { %p1050_p7 = pneg %p1049_p5 }
 0x210   : > { %p1056_p9 = por %p1055_p10, %p1054_p0 }
 0x212   : > { %p1057_p12 = pnand %p1056_p9, %p1050_p7 }
 0x214   : > { %1060 = shalt.err (!%p1057_p12)
}
 0x215   : > { %863 = dma.vmem_to_hbm [thread:$0]  (%p1535_p8), %s1452_s9, 128, %s1450_s1, %s647_s21  }
 0x216 PF: > { %s673_s15 = sand.u32 1, %s1099_s18   ;;  %p1536_p1 = scmp.ne.s32.totalorder %s1521_s8, 0 }
 0x217   : > { %p1537_p6 = scmp.ge.s32.totalorder %s1119_s23, 2  ;;  %s674_s0 = scalar_lea.sflag [#allocation4], %s673_s15 }
 0x219   : > { %p876_p13 = pnand %p1537_p6, %p1536_p1 }
 0x21b   : > { %1094 = dma.done.wait (!%p876_p13), %s674_s0, 128  }
 0x21c   : > { %1096 = vsyncadd (!%p876_p13), %s674_s0, 4294967168  ;;  %s24_s23 = sadd.s32 1, %s1119_s23   ;;  %s1538_s26 = sld [smem:[#allocation12_spill]] }
 0x21d   : > { %p21_p11 = scmp.ge.s32.totalorder %s24_s23, 4   ;;  %s1539_s20 = sld [smem:[#allocation14_spill]] }
 0x21e   : > { %s1540_s6 = sld [smem:[#allocation13_spill]]  ;;  %s1541_s18 = smov %s1103_s19 }
 0x21f   : > { %s1543_s21 = smov %s1115_s22  ;;  %23 = sbr.rel (!%p21_p11) target bundleno = 11 (0xb), region = 115 }
 0x222   : > { %s1542_s19 = smov %s1538_s26 }
 0x224   : > { %s1544_s22 = smov %s1540_s6 }
 0x226   :  { %679 = vsyncpa [#allocation3], 1 }
 0x227   :  { %681 = vsyncpa [#allocation3 + $0x1], 1 }
 0x228   :  { %682 = vsyncpa [#allocation6], 1 }
 0x229   :  { %684 = vsyncpa [#allocation6 + $0x1], 1 }
 0x22a   :  { %685 = vsyncpa [#allocation4], 1 }
 0x22b   :  { %687 = vsyncpa [#allocation4 + $0x1], 1 }

</bundles_post_ra>
